<compile_context>
chip_gen: v7x
topology: tpu7x:2x2x1
jax: 0.10.0
libtpu: 0.0.40
codegen_flags: <defaults>
</compile_context>

<pallas_src>
import jax
import jax.numpy as jnp
from jax.experimental import pallas as pl
from jax.experimental.pallas import tpu as pltpu


def _round_up(n, m):
    return ((n + m - 1) // m) * m


def _mlp_kernel(x_ref, w1_ref, b1_ref, w2_ref, b2_ref, w3_ref, b3_ref, o_ref):
    x = x_ref[...]                                              # (TB, 784) bf16
    # fc1 + relu  (f32 accumulate, cast back to bf16 to feed the next MXU pass)
    h1 = jnp.dot(x, w1_ref[...], preferred_element_type=jnp.float32)
    h1 = jnp.maximum(h1 + b1_ref[...], 0.0).astype(jnp.bfloat16)   # (TB, 256)
    # fc2 + relu
    h2 = jnp.dot(h1, w2_ref[...], preferred_element_type=jnp.float32)
    h2 = jnp.maximum(h2 + b2_ref[...], 0.0).astype(jnp.bfloat16)   # (TB, 128)
    # fc3 (logits, padded to 128 lane-dense output columns; cols 10..127 are 0-weight)
    out = jnp.dot(h2, w3_ref[...], preferred_element_type=jnp.float32)
    o_ref[...] = (out + b3_ref[...]).astype(o_ref.dtype)           # (TB, 128)


def kmnist_classifier_forward(x, params, *, max_tile=512):
    """x: (B, 1, 28, 28) float32 (NCHW). Returns logits (B, 10) float32."""
    w1, b1, w2, b2, w3, b3 = params
    B = x.shape[0]

    # Flatten exactly like torch's x.view(B, -1); cast activations/weights to
    # bf16 for the DMA-bound matmuls (accumulation stays f32 inside the kernel).
    x_flat = x.reshape(B, -1).astype(jnp.bfloat16)              # (B, 784)
    w1b = w1.astype(jnp.bfloat16)                               # (784, 256)
    w2b = w2.astype(jnp.bfloat16)                               # (256, 128)
    # Pad fc3 to a lane-dense 128-wide output (zero columns 10..127).
    w3p = jnp.zeros((128, 128), jnp.bfloat16).at[:, :10].set(w3.astype(jnp.bfloat16))
    b3p = jnp.zeros((1, 128), jnp.float32).at[:, :10].set(b3.astype(jnp.float32))
    b1f = b1.astype(jnp.float32)                                # (1, 256)
    b2f = b2.astype(jnp.float32)                                # (1, 128)

    # Batch tile: <=512 rows (safe on v5e 16 MiB scoped VMEM and v7x 64 MiB),
    # rounded so the sublane dim is a multiple of 8.
    TB = min(max_tile, _round_up(B, 8))
    B_pad = _round_up(B, TB)
    if B_pad != B:
        x_flat = jnp.pad(x_flat, ((0, B_pad - B), (0, 0)))

    grid = (B_pad // TB,)
    out = pl.pallas_call(
        _mlp_kernel,
        out_shape=jax.ShapeDtypeStruct((B_pad, 128), jnp.float32),
        grid_spec=pltpu.PrefetchScalarGridSpec(
            num_scalar_prefetch=0,
            grid=grid,
            in_specs=[
                pl.BlockSpec((TB, 784), lambda i: (i, 0)),      # x: tiled over batch
                pl.BlockSpec((784, 256), lambda i: (0, 0)),     # w1: VMEM-resident
                pl.BlockSpec((1, 256), lambda i: (0, 0)),       # b1
                pl.BlockSpec((256, 128), lambda i: (0, 0)),     # w2
                pl.BlockSpec((1, 128), lambda i: (0, 0)),       # b2
                pl.BlockSpec((128, 128), lambda i: (0, 0)),     # w3 (padded)
                pl.BlockSpec((1, 128), lambda i: (0, 0)),       # b3 (padded)
            ],
            out_specs=pl.BlockSpec((TB, 128), lambda i: (i, 0)),
        ),
        compiler_params=pltpu.CompilerParams(
            dimension_semantics=("parallel",),                  # v7x: 2 TCs share the batch grid
        ),
    )(x_flat, w1b, b1f, w2b, b2f, w3p, b3p)

    return out[:B, :10]


def init_params(key):
    """Deterministic init mimicking nn.Linear defaults (uniform +/- 1/sqrt(fan_in)).
    Weights stored as (in_features, out_features) so the kernel computes x @ W + b."""
    def linear(key, fan_in, fan_out):
        kw, kb = jax.random.split(key)
        bound = 1.0 / jnp.sqrt(float(fan_in))
        w = jax.random.uniform(kw, (fan_in, fan_out), jnp.float32, -bound, bound)
        b = jax.random.uniform(kb, (1, fan_out), jnp.float32, -bound, bound)
        return w, b

    k1, k2, k3 = jax.random.split(key, 3)
    w1, b1 = linear(k1, 28 * 28, 256)
    w2, b2 = linear(k2, 256, 128)
    w3, b3 = linear(k3, 128, 10)
    return (w1, b1, w2, b2, w3, b3)


if __name__ == "__main__":
    key = jax.random.PRNGKey(0)
    k_params, k_x = jax.random.split(key)

    params = init_params(k_params)
    # Small batch of fake KMNIST images, NCHW like PyTorch.
    # NOTE: B=8 leaves the MXU mostly idle; real workloads should batch >=256 rows.
    x = jax.random.normal(k_x, (8, 1, 28, 28), dtype=jnp.float32)

    logits = kmnist_classifier_forward(x, params)
    logits = jax.block_until_ready(logits)
    assert logits.shape == (8, 10)

    # Reference 1: same bf16-cast math in plain JAX (should match tightly).
    w1, b1, w2, b2, w3, b3 = params
    xf = x.reshape(x.shape[0], -1).astype(jnp.bfloat16)
    h = jnp.dot(xf, w1.astype(jnp.bfloat16), preferred_element_type=jnp.float32)
    h = jnp.maximum(h + b1, 0.0).astype(jnp.bfloat16)
    h = jnp.dot(h, w2.astype(jnp.bfloat16), preferred_element_type=jnp.float32)
    h = jnp.maximum(h + b2, 0.0).astype(jnp.bfloat16)
    ref_bf16 = jnp.dot(h, w3.astype(jnp.bfloat16), preferred_element_type=jnp.float32) + b3
    assert jnp.allclose(logits, ref_bf16, atol=2e-2, rtol=2e-2)

    # Reference 2: full f32 PyTorch-equivalent math (loose tolerance for bf16 weights).
    xf32 = x.reshape(x.shape[0], -1)
    ref = jnp.maximum(xf32 @ w1 + b1, 0.0)
    ref = jnp.maximum(ref @ w2 + b2, 0.0)
    ref = ref @ w3 + b3
    assert jnp.allclose(logits, ref, atol=5e-2, rtol=5e-2)

    print("KERNEL_OK")
</pallas_src>

<mosaic_0001>
module attributes {stable_mosaic.version = 11 : i64} {
  func.func @_mlp_kernel(%arg0: i32, %arg1: memref<8x784xbf16, #tpu.memory_space<vmem>>, %arg2: memref<784x256xbf16, #tpu.memory_space<vmem>>, %arg3: memref<1x256xf32, #tpu.memory_space<vmem>>, %arg4: memref<256x128xbf16, #tpu.memory_space<vmem>>, %arg5: memref<1x128xf32, #tpu.memory_space<vmem>>, %arg6: memref<128x128xbf16, #tpu.memory_space<vmem>>, %arg7: memref<1x128xf32, #tpu.memory_space<vmem>>, %arg8: memref<8x128xf32, #tpu.memory_space<vmem>>) attributes {dimension_semantics = [#tpu.dimension_semantics<parallel>], iteration_bounds = array<i64: 1>, scalar_prefetch = 0 : i64, scratch_operands = 0 : i64, tpu.core_type = #tpu.core_type<tc>, window_params = [{transform_indices = @transform_0, window_bounds = array<i64: 8, 784>}, {pipeline_mode = #tpu.pipeline_mode<synchronous>, transform_indices = @transform_1, window_bounds = array<i64: 784, 256>}, {pipeline_mode = #tpu.pipeline_mode<synchronous>, transform_indices = @transform_2, window_bounds = array<i64: 1, 256>}, {pipeline_mode = #tpu.pipeline_mode<synchronous>, transform_indices = @transform_3, window_bounds = array<i64: 256, 128>}, {pipeline_mode = #tpu.pipeline_mode<synchronous>, transform_indices = @transform_4, window_bounds = array<i64: 1, 128>}, {pipeline_mode = #tpu.pipeline_mode<synchronous>, transform_indices = @transform_5, window_bounds = array<i64: 128, 128>}, {pipeline_mode = #tpu.pipeline_mode<synchronous>, transform_indices = @transform_6, window_bounds = array<i64: 1, 128>}, {transform_indices = @transform_7, window_bounds = array<i64: 8, 128>}]} {
    %c0 = arith.constant 0 : index
    %c0_0 = arith.constant 0 : index
    %0 = vector.load %arg1[%c0, %c0_0] : memref<8x784xbf16, #tpu.memory_space<vmem>>, vector<8x784xbf16>
    %c0_1 = arith.constant 0 : index
    %c0_2 = arith.constant 0 : index
    %1 = vector.load %arg2[%c0_1, %c0_2] : memref<784x256xbf16, #tpu.memory_space<vmem>>, vector<784x256xbf16>
    %cst = arith.constant dense<0.000000e+00> : vector<8x256xf32>
    %2 = tpu.matmul %0, %1, %cst {dimension_numbers = #tpu.dot_dimension_numbers<[1], [0], [0], [1], [0, 0, 1, 1], [], []>} : vector<8x784xbf16>, vector<784x256xbf16>, vector<8x256xf32> -> vector<8x256xf32>
    %c0_3 = arith.constant 0 : index
    %c0_4 = arith.constant 0 : index
    %3 = vector.load %arg3[%c0_3, %c0_4] : memref<1x256xf32, #tpu.memory_space<vmem>>, vector<1x256xf32>
    %4 = vector.broadcast %3 : vector<1x256xf32> to vector<8x256xf32>
    %5 = arith.addf %2, %4 : vector<8x256xf32>
    %cst_5 = arith.constant 0.000000e+00 : f32
    %6 = vector.broadcast %cst_5 : f32 to vector<8x256xf32>
    %7 = arith.maximumf %5, %6 : vector<8x256xf32>
    %8 = arith.truncf %7 : vector<8x256xf32> to vector<8x256xbf16>
    %c0_6 = arith.constant 0 : index
    %c0_7 = arith.constant 0 : index
    %9 = vector.load %arg4[%c0_6, %c0_7] : memref<256x128xbf16, #tpu.memory_space<vmem>>, vector<256x128xbf16>
    %cst_8 = arith.constant dense<0.000000e+00> : vector<8x128xf32>
    %10 = tpu.matmul %8, %9, %cst_8 {dimension_numbers = #tpu.dot_dimension_numbers<[1], [0], [0], [1], [0, 0, 1, 1], [], []>} : vector<8x256xbf16>, vector<256x128xbf16>, vector<8x128xf32> -> vector<8x128xf32>
    %c0_9 = arith.constant 0 : index
    %c0_10 = arith.constant 0 : index
    %11 = vector.load %arg5[%c0_9, %c0_10] : memref<1x128xf32, #tpu.memory_space<vmem>>, vector<1x128xf32>
    %12 = vector.broadcast %11 : vector<1x128xf32> to vector<8x128xf32>
    %13 = arith.addf %10, %12 : vector<8x128xf32>
    %cst_11 = arith.constant 0.000000e+00 : f32
    %14 = vector.broadcast %cst_11 : f32 to vector<8x128xf32>
    %15 = arith.maximumf %13, %14 : vector<8x128xf32>
    %16 = arith.truncf %15 : vector<8x128xf32> to vector<8x128xbf16>
    %c0_12 = arith.constant 0 : index
    %c0_13 = arith.constant 0 : index
    %17 = vector.load %arg6[%c0_12, %c0_13] : memref<128x128xbf16, #tpu.memory_space<vmem>>, vector<128x128xbf16>
    %cst_14 = arith.constant dense<0.000000e+00> : vector<8x128xf32>
    %18 = tpu.matmul %16, %17, %cst_14 {dimension_numbers = #tpu.dot_dimension_numbers<[1], [0], [0], [1], [0, 0, 1, 1], [], []>} : vector<8x128xbf16>, vector<128x128xbf16>, vector<8x128xf32> -> vector<8x128xf32>
    %c0_15 = arith.constant 0 : index
    %c0_16 = arith.constant 0 : index
    %19 = vector.load %arg7[%c0_15, %c0_16] : memref<1x128xf32, #tpu.memory_space<vmem>>, vector<1x128xf32>
    %20 = vector.broadcast %19 : vector<1x128xf32> to vector<8x128xf32>
    %21 = arith.addf %18, %20 : vector<8x128xf32>
    %c0_17 = arith.constant 0 : index
    %c0_18 = arith.constant 0 : index
    %22 = vector.load %arg8[%c0_17, %c0_18] : memref<8x128xf32, #tpu.memory_space<vmem>>, vector<8x128xf32>
    tpu.vector_store %arg8[%c0_17, %c0_18], %21 {strides = array<i32>} : memref<8x128xf32, #tpu.memory_space<vmem>>, vector<8x128xf32>,
    return
  }
  func.func @transform_0(%arg0: i32) -> (i32, i32) {
    %c0_i32 = arith.constant 0 : i32
    %c0_i32_0 = arith.constant 0 : i32
    return %arg0, %c0_i32 : i32, i32
  }
  func.func @transform_1(%arg0: i32) -> (i32, i32) {
    %c0_i32 = arith.constant 0 : i32
    %c0_i32_0 = arith.constant 0 : i32
    %c0_i32_1 = arith.constant 0 : i32
    return %c0_i32, %c0_i32_0 : i32, i32
  }
  func.func @transform_2(%arg0: i32) -> (i32, i32) {
    %c0_i32 = arith.constant 0 : i32
    %c0_i32_0 = arith.constant 0 : i32
    %c0_i32_1 = arith.constant 0 : i32
    return %c0_i32, %c0_i32_0 : i32, i32
  }
  func.func @transform_3(%arg0: i32) -> (i32, i32) {
    %c0_i32 = arith.constant 0 : i32
    %c0_i32_0 = arith.constant 0 : i32
    %c0_i32_1 = arith.constant 0 : i32
    return %c0_i32, %c0_i32_0 : i32, i32
  }
  func.func @transform_4(%arg0: i32) -> (i32, i32) {
    %c0_i32 = arith.constant 0 : i32
    %c0_i32_0 = arith.constant 0 : i32
    %c0_i32_1 = arith.constant 0 : i32
    return %c0_i32, %c0_i32_0 : i32, i32
  }
  func.func @transform_5(%arg0: i32) -> (i32, i32) {
    %c0_i32 = arith.constant 0 : i32
    %c0_i32_0 = arith.constant 0 : i32
    %c0_i32_1 = arith.constant 0 : i32
    return %c0_i32, %c0_i32_0 : i32, i32
  }
  func.func @transform_6(%arg0: i32) -> (i32, i32) {
    %c0_i32 = arith.constant 0 : i32
    %c0_i32_0 = arith.constant 0 : i32
    %c0_i32_1 = arith.constant 0 : i32
    return %c0_i32, %c0_i32_0 : i32, i32
  }
  func.func @transform_7(%arg0: i32) -> (i32, i32) {
    %c0_i32 = arith.constant 0 : i32
    %c0_i32_0 = arith.constant 0 : i32
    return %arg0, %c0_i32 : i32, i32
  }
}

</mosaic_0001>

<bundles_post_ra>
// kernel: tpu_custom_call.1
= control target key start
LH: loop header
LB: loop body
LE: loop exit
PB: predicated region body
PF: predicated region fallthrough
CT: control target
= control target key end

     0   :  { %12 = vsyncpa [#allocation3], 0  ;;  %s1823_s0 = inlined_call_operand.hbm [shape: bf16[8,784], index: 0, kind: input, shape index: {}]   ;;  %s1824_s1 = inlined_call_operand.hbm [shape: bf16[784,256], index: 1, kind: input, shape index: {}]   ;;  %s1825_s2 = inlined_call_operand.vmem [shape: f32[1,256], index: 2, kind: input, shape index: {}]   ;;  %s1826_s3 = inlined_call_operand.hbm [shape: bf16[256,128], index: 3, kind: input, shape index: {}]   ;;  %s1827_s4 = inlined_call_operand.vmem [shape: f32[1,128], index: 4, kind: input, shape index: {}]   ;;  %s1828_s5 = inlined_call_operand.hbm [shape: bf16[128,128], index: 5, kind: input, shape index: {}]   ;;  %s1829_s6 = inlined_call_operand.vmem [shape: f32[1,128], index: 6, kind: input, shape index: {}]   ;;  %s1830_s7 = inlined_call_operand.hbm [shape: f32[8,128], index: 7, kind: output, shape index: {}]  }
   0x1   :  { %13 = vsyncpa [#allocation6], 0 }
   0x2   :  { %14 = vsyncpa [#allocation9], 0 }
   0x3   :  { %15 = vsyncpa [#allocation4], 0  ;;  %s1690_s24 = smov [#allocation5]   ;;  %s1572_s28 = scalar_lea.hbm %s1824_s1, 12544 }
   0x4   :  { %s31_s25 = sshll.u32 %s1690_s24, 4  ;;  %p1573_p0 = scmp.ne.s32.totalorder %s1824_s1, %s1572_s28  ;;  %s32_s25 = int_to_ptr.vmem [resolvable:$true] %s31_s25 }
   0x5   :  { %p1576_p1 = scmp.lt.u32.totalorder %s1572_s28, %s1824_s1 }
   0x7   :  { %p1578_p2 = pnand %p1576_p1, %p1573_p0 }
   0x9   :  { %1581 = shalt.err (!%p1578_p2)
}
   0xa   :  { %s1582_s10 = scalar_lea.vmem %s32_s25, 12544  ;;  %p1587_p4 = scmp.lt.s32.totalorder %s32_s25, %s32_s25 }
   0xb   :  { %p1583_p3 = scmp.ne.s32.totalorder %s32_s25, %s1582_s10  ;;  %p1588_p5 = scmp.lt.s32.totalorder %s1582_s10, %s1582_s10 }
   0xd   :  { %p1589_p6 = por %p1588_p5, %p1587_p4 }
   0xf   :  { %p1590_p7 = pnand %p1589_p6, %p1583_p3 }
  0x11   :  { %1593 = shalt.err (!%p1590_p7)
}
  0x12   :  { %s1691_s11 = smov 128   ;;  %s1692_s12 = smov 8  }
  0x13   :  { %37 = dma.hbm_to_vmem [thread:$0]  %s1824_s1, 12544, %s32_s25, [#allocation6], %s1691_s11, %s1691_s11, %s1692_s12  }
  0x14   :  { %s1693_s15 = smov [#allocation2]   ;;  %s1694_s17 = smov [#allocation7]  }
  0x15   :  { %s22_s16 = sshll.u32 %s1693_s15, 4  ;;  %s45_s18 = sshll.u32 %s1694_s17, 4  ;;  %s23_s16 = int_to_ptr.vmem [resolvable:$true] %s22_s16  ;;  %s46_s18 = int_to_ptr.vmem [resolvable:$true] %s45_s18 }
  0x16   :  { %s1594_s21 = scalar_lea.hbm %s1823_s0, 448 }
  0x17   :  { %p1595_p8 = scmp.ne.s32.totalorder %s1823_s0, %s1594_s21  ;;  %p1598_p9 = scmp.lt.u32.totalorder %s1594_s21, %s1823_s0 }
  0x19   :  { %p1600_p10 = pnand %p1598_p9, %p1595_p8 }
  0x1b   :  { %1603 = shalt.err (!%p1600_p10)
}
  0x1c   :  { %s1604_s1 = scalar_lea.vmem %s23_s16, 448  ;;  %p1609_p12 = scmp.lt.s32.totalorder %s23_s16, %s23_s16 }
  0x1d   :  { %p1605_p11 = scmp.ne.s32.totalorder %s23_s16, %s1604_s1  ;;  %p1610_p13 = scmp.lt.s32.totalorder %s1604_s1, %s1604_s1 }
  0x1f   :  { %p1611_p0 = por %p1610_p13, %p1609_p12 }
  0x21   :  { %p1612_p1 = pnand %p1611_p0, %p1605_p11 }
  0x23   :  { %1615 = shalt.err (!%p1612_p1)
}
  0x24   :  { %25 = dma.hbm_to_vmem [thread:$0]  %s1823_s0, 448, %s23_s16, [#allocation3]  }
  0x25   :  { %s1616_s30 = scalar_lea.hbm %s1826_s3, 2048 }
  0x26   :  { %p1617_p2 = scmp.ne.s32.totalorder %s1826_s3, %s1616_s30  ;;  %p1620_p3 = scmp.lt.u32.totalorder %s1616_s30, %s1826_s3 }
  0x28   :  { %p1622_p4 = pnand %p1620_p3, %p1617_p2 }
  0x2a   :  { %1625 = shalt.err (!%p1622_p4)
}
  0x2b   :  { %s1626_s12 = scalar_lea.vmem %s46_s18, 2048  ;;  %p1631_p6 = scmp.lt.s32.totalorder %s46_s18, %s46_s18 }
  0x2c   :  { %p1627_p5 = scmp.ne.s32.totalorder %s46_s18, %s1626_s12  ;;  %p1632_p7 = scmp.lt.s32.totalorder %s1626_s12, %s1626_s12 }
  0x2e   :  { %p1633_p8 = por %p1632_p7, %p1631_p6 }
  0x30   :  { %p1634_p9 = pnand %p1633_p8, %p1627_p5 }
  0x32   :  { %1637 = shalt.err (!%p1634_p9)
}
  0x33   :  { %s1695_s0 = smov 64   ;;  %s1696_s13 = smov 4  }
  0x34   :  { %51 = dma.hbm_to_vmem [thread:$0]  %s1826_s3, 2048, %s46_s18, [#allocation6], %s1695_s0, %s1695_s0, %s1696_s13  }
  0x35   :  { %s1697_s16 = smov [#allocation8]   ;;  %s1638_s21 = scalar_lea.hbm %s1828_s5, 1024 }
  0x36   :  { %s59_s17 = sshll.u32 %s1697_s16, 4  ;;  %p1639_p10 = scmp.ne.s32.totalorder %s1828_s5, %s1638_s21  ;;  %s60_s17 = int_to_ptr.vmem [resolvable:$true] %s59_s17 }
  0x37   :  { %p1642_p11 = scmp.lt.u32.totalorder %s1638_s21, %s1828_s5 }
  0x39   :  { %p1644_p12 = pnand %p1642_p11, %p1639_p10 }
  0x3b   :  { %1647 = shalt.err (!%p1644_p12)
}
  0x3c   :  { %s1648_s1 = scalar_lea.vmem %s60_s17, 1024  ;;  %p1653_p0 = scmp.lt.s32.totalorder %s60_s17, %s60_s17 }
  0x3d   :  { %p1649_p13 = scmp.ne.s32.totalorder %s60_s17, %s1648_s1  ;;  %p1654_p1 = scmp.lt.s32.totalorder %s1648_s1, %s1648_s1 }
  0x3f   :  { %p1655_p2 = por %p1654_p1, %p1653_p0 }
  0x41   :  { %p1656_p3 = pnand %p1655_p2, %p1649_p13 }
  0x43   :  { %1659 = shalt.err (!%p1656_p3)
}
  0x44   :  { %65 = dma.hbm_to_vmem [thread:$0]  %s1828_s5, 1024, %s60_s17, [#allocation9], %s1695_s0, %s1695_s0, %s1696_s13  }
  0x45   :  { %1682 = dma.done.wait [#allocation3], 448  }
  0x46   :  { %1683 = vsyncadd [#allocation3], 4294966848 }
  0x47   :  { %1684 = dma.done.wait [#allocation6], 14592  }
  0x48   :  { %1685 = vsyncadd [#allocation6], 4294952704 }
  0x49   :  { %1686 = dma.done.wait [#allocation9], 1024  }
  0x4a   :  { %1687 = vsyncadd [#allocation9], 4294966272  ;;  %v1394_v0 = vld [vmem:[#allocation5 + $0x104] ss:$8 sps:$4 sm:$0xff]   ;;  %v1396_v1 = vld [vmem:[#allocation5 + $0x100] ss:$8 sps:$4 sm:$0xff]  }
  0x4b   :  { %754 = vmatprep.subr.bf16.mxu0 %v1394_v0  ;;  %v1397_v2 = vld [vmem:[#allocation5 + $0x114] ss:$8 sps:$4 sm:$0xff]   ;;  %v1399_v3 = vld [vmem:[#allocation5 + $0x110] ss:$8 sps:$4 sm:$0xff]   ;;  %v1400_v4 = vld [vmem:[#allocation5 + $0x124] ss:$8 sps:$4 sm:$0xff]  }
  0x4c   :  { %755 = vmatpush1.bf16.msra.mxu0 %v1396_v1  ;;  %v1402_v5 = vld [vmem:[#allocation5 + $0x120] ss:$8 sps:$4 sm:$0xff]   ;;  %v1403_v6 = vld [vmem:[#allocation5 + $0x134] ss:$8 sps:$4 sm:$0xff]   ;;  %v1405_v7 = vld [vmem:[#allocation5 + $0x130] ss:$8 sps:$4 sm:$0xff]  }
  0x4d   :  { %756 = vmatprep.subr.bf16.mxu0 %v1397_v2  ;;  %v1406_v8 = vld [vmem:[#allocation5 + $0x144] ss:$8 sps:$4 sm:$0xff]   ;;  %v1408_v9 = vld [vmem:[#allocation5 + $0x140] ss:$8 sps:$4 sm:$0xff]   ;;  %v1409_v10 = vld [vmem:[#allocation5 + $0x154] ss:$8 sps:$4 sm:$0xff]  }
  0x4e   :  { %v1411_v11 = vld [vmem:[#allocation5 + $0x150] ss:$8 sps:$4 sm:$0xff]   ;;  %v1412_v12 = vld [vmem:[#allocation5 + $0x164] ss:$8 sps:$4 sm:$0xff]   ;;  %v1414_v15 = vld [vmem:[#allocation5 + $0x160] ss:$8 sps:$4 sm:$0xff]  }
  0x4f   :  { %v1790_v13 = vld [vmem:[#allocation2 + $0x8] sm:$0xff]  ;;  %v1415_v16 = vld [vmem:[#allocation5 + $0x174] ss:$8 sps:$4 sm:$0xff]   ;;  %v1455_v19 = vld [vmem:[#allocation5] ss:$8 sps:$4 sm:$0xff]   ;;  %vm709_vm0 = vcmask 130048  }
  0x50   :  { %757 = vmatpush1.bf16.msra.mxu0 %v1399_v3  ;;  %v1190_v14 = vcombine.high %v1790_v13, %v1790_v13  ;;  %v1450_v17 = vld [vmem:[#allocation5 + $0x4] ss:$8 sps:$4 sm:$0xff]   ;;  %v1417_v18 = vld [vmem:[#allocation5 + $0x170] ss:$8 sps:$4 sm:$0xff]   ;;  %v1456_v20 = vld [vmem:[#allocation5 + $0x14] ss:$8 sps:$4 sm:$0xff]   ;;  %v1189_v57 = vcombine.low %v1790_v13, %v1790_v13 }
  0x51   :  { %758 = vmatprep.subr.bf16.mxu0 %v1400_v4  ;;  %713 = vmatprep.subr.bf16.mxu1 %v1450_v17  ;;  %v1418_v21 = vld [vmem:[#allocation5 + $0x184] ss:$8 sps:$4 sm:$0xff]   ;;  %v1461_v22 = vld [vmem:[#allocation5 + $0x10] ss:$8 sps:$4 sm:$0xff]   ;;  %v1420_v24 = vld [vmem:[#allocation5 + $0x180] ss:$8 sps:$4 sm:$0xff]  }
  0x52   :  { %786 = vmatprep.mubr.bf16.mxu0 %v1190_v14  ;;  %714 = vmatpush1.bf16.msra.mxu1 %v1455_v19  ;;  %v1462_v23 = vld [vmem:[#allocation5 + $0x24] ss:$8 sps:$4 sm:$0xff]   ;;  %v1421_v25 = vld [vmem:[#allocation5 + $0x194] ss:$8 sps:$4 sm:$0xff]   ;;  %v1467_v26 = vld [vmem:[#allocation5 + $0x20] ss:$8 sps:$4 sm:$0xff]  }
  0x53   :  { %715 = vmatprep.subr.bf16.mxu1 %v1456_v20  ;;  %v1468_v27 = vld [vmem:[#allocation5 + $0x34] ss:$8 sps:$4 sm:$0xff]   ;;  %v1423_v28 = vld [vmem:[#allocation5 + $0x190] ss:$8 sps:$4 sm:$0xff]   ;;  %v1424_v29 = vld [vmem:[#allocation5 + $0x1a4] ss:$8 sps:$4 sm:$0xff]  }
  0x54   :  { %759 = vmatpush1.bf16.msra.mxu0 %v1402_v5  ;;  %v1473_v30 = vld [vmem:[#allocation5 + $0x30] ss:$8 sps:$4 sm:$0xff]   ;;  %v1474_v31 = vld [vmem:[#allocation5 + $0x44] ss:$8 sps:$4 sm:$0xff]   ;;  %v1426_v32 = vld [vmem:[#allocation5 + $0x1a0] ss:$8 sps:$4 sm:$0xff]  }
  0x55   :  { %760 = vmatprep.subr.bf16.mxu0 %v1403_v6  ;;  %v1427_v33 = vld [vmem:[#allocation5 + $0x1b4] ss:$8 sps:$4 sm:$0xff]   ;;  %v1479_v34 = vld [vmem:[#allocation5 + $0x40] ss:$8 sps:$4 sm:$0xff]   ;;  %v1429_v36 = vld [vmem:[#allocation5 + $0x1b0] ss:$8 sps:$4 sm:$0xff]  }
  0x56   :  { %716 = vmatpush1.bf16.msra.mxu1 %v1461_v22  ;;  %v1480_v35 = vld [vmem:[#allocation5 + $0x54] ss:$8 sps:$4 sm:$0xff]   ;;  %v1430_v37 = vld [vmem:[#allocation5 + $0x1c4] ss:$8 sps:$4 sm:$0xff]   ;;  %v1485_v38 = vld [vmem:[#allocation5 + $0x50] ss:$8 sps:$4 sm:$0xff]  }
  0x57   :  { %717 = vmatprep.subr.bf16.mxu1 %v1462_v23  ;;  %v1486_v39 = vld [vmem:[#allocation5 + $0x64] ss:$8 sps:$4 sm:$0xff]   ;;  %v1432_v40 = vld [vmem:[#allocation5 + $0x1c0] ss:$8 sps:$4 sm:$0xff]   ;;  %v1433_v41 = vld [vmem:[#allocation5 + $0x1d4] ss:$8 sps:$4 sm:$0xff]  }
  0x58   :  { %761 = vmatpush1.bf16.msra.mxu0 %v1405_v7  ;;  %v1491_v42 = vld [vmem:[#allocation5 + $0x60] ss:$8 sps:$4 sm:$0xff]   ;;  %v1492_v43 = vld [vmem:[#allocation5 + $0x74] ss:$8 sps:$4 sm:$0xff]   ;;  %v1435_v44 = vld [vmem:[#allocation5 + $0x1d0] ss:$8 sps:$4 sm:$0xff]  }
  0x59   :  { %762 = vmatprep.subr.bf16.mxu0 %v1406_v8  ;;  %v1436_v45 = vld [vmem:[#allocation5 + $0x1e4] ss:$8 sps:$4 sm:$0xff]   ;;  %v1497_v46 = vld [vmem:[#allocation5 + $0x70] ss:$8 sps:$4 sm:$0xff]   ;;  %v1438_v48 = vld [vmem:[#allocation5 + $0x1e0] ss:$8 sps:$4 sm:$0xff]  }
  0x5a   :  { %718 = vmatpush1.bf16.msra.mxu1 %v1467_v26  ;;  %v1498_v47 = vld [vmem:[#allocation5 + $0x84] ss:$8 sps:$4 sm:$0xff]   ;;  %v1439_v49 = vld [vmem:[#allocation5 + $0x1f4] ss:$8 sps:$4 sm:$0xff]   ;;  %v1503_v50 = vld [vmem:[#allocation5 + $0x80] ss:$8 sps:$4 sm:$0xff]  }
  0x5b   :  { %719 = vmatprep.subr.bf16.mxu1 %v1468_v27  ;;  %v1504_v51 = vld [vmem:[#allocation5 + $0x94] ss:$8 sps:$4 sm:$0xff]   ;;  %v1441_v52 = vld [vmem:[#allocation5 + $0x1f0] ss:$8 sps:$4 sm:$0xff]   ;;  %v1446_v53 = vld [vmem:[#allocation5 + $0x204] ss:$8 sps:$4 sm:$0xff]  }
  0x5c   :  { %763 = vmatpush1.bf16.msra.mxu0 %v1408_v9  ;;  %v1509_v54 = vld [vmem:[#allocation5 + $0x90] ss:$8 sps:$4 sm:$0xff]   ;;  %v1510_v55 = vld [vmem:[#allocation5 + $0xa4] ss:$8 sps:$4 sm:$0xff]   ;;  %v1444_v58 = vld [vmem:[#allocation5 + $0x200] ss:$8 sps:$4 sm:$0xff]  }
  0x5d   :  { %764 = vmatprep.subr.bf16.mxu0 %v1409_v10  ;;  %v1794_v56 = vld [vmem:[#allocation2 + $0x10] sm:$0xff]  ;;  %v1515_v61 = vld [vmem:[#allocation5 + $0xa0] ss:$8 sps:$4 sm:$0xff]   ;;  %v1454_v1 = vld [vmem:[#allocation5 + $0x224] ss:$8 sps:$4 sm:$0xff]   ;;  %vm1700_vm1 = vmmov 0  }
  0x5e   :  { %720 = vmatpush1.bf16.msra.mxu1 %v1473_v30  ;;  %v1192_v59 = vcombine.high %v1794_v56, %v1794_v56  ;;  %v1449_v60 = vld [vmem:[#allocation5 + $0x214] ss:$8 sps:$4 sm:$0xff]   ;;  %v1447_v63 = vld [vmem:[#allocation5 + $0x210] ss:$8 sps:$4 sm:$0xff]   ;;  %v81_v0 = vld [vmem:[#allocation2] sm:$0xff]  ;;  %s1701_s30 = smov [#allocation10]  }
  0x5f   :  { %721 = vmatprep.subr.bf16.mxu1 %v1474_v31  ;;  %v1516_v62 = vld [vmem:[#allocation5 + $0xb4] ss:$8 sps:$4 sm:$0xff]   ;;  %v1188_v2 = vcombine.high %v81_v0, %v81_v0  ;;  %v1521_v3 = vld [vmem:[#allocation5 + $0xb0] ss:$8 sps:$4 sm:$0xff]   ;;  %v1522_v4 = vld [vmem:[#allocation5 + $0xc4] ss:$8 sps:$4 sm:$0xff]   ;;  %v1187_v22 = vcombine.low %v81_v0, %v81_v0 }
  0x60   :  { %765 = vmatpush1.bf16.msra.mxu0 %v1411_v11  ;;  %v1452_v5 = vld [vmem:[#allocation5 + $0x220] ss:$8 sps:$4 sm:$0xff]   ;;  %v1460_v6 = vld [vmem:[#allocation5 + $0x234] ss:$8 sps:$4 sm:$0xff]   ;;  %v1458_v9 = vld [vmem:[#allocation5 + $0x230] ss:$8 sps:$4 sm:$0xff]  }
  0x61   :  { %766 = vmatprep.subr.bf16.mxu0 %v1412_v12  ;;  %745 = vmatprep.mubr.bf16.mxu1 %v1188_v2  ;;  %v1527_v7 = vld [vmem:[#allocation5 + $0xc0] ss:$8 sps:$4 sm:$0xff]   ;;  %v1528_v8 = vld [vmem:[#allocation5 + $0xd4] ss:$8 sps:$4 sm:$0xff]   ;;  %v1466_v10 = vld [vmem:[#allocation5 + $0x244] ss:$8 sps:$4 sm:$0xff]   ;;  %v185_v2 = vlaneseq }
  0x62   :  { %722 = vmatpush1.bf16.msra.mxu1 %v1479_v34  ;;  %v1533_v11 = vld [vmem:[#allocation5 + $0xd0] ss:$8 sps:$4 sm:$0xff]   ;;  %v1464_v12 = vld [vmem:[#allocation5 + $0x240] ss:$8 sps:$4 sm:$0xff]   ;;  %v1536_v13 = vld [vmem:[#allocation5 + $0xe4] ss:$8 sps:$4 sm:$0xff]  }
  0x63   :  { %723 = vmatprep.subr.bf16.mxu1 %v1480_v35  ;;  %v1472_v14 = vld [vmem:[#allocation5 + $0x254] ss:$8 sps:$4 sm:$0xff]   ;;  %v1470_v17 = vld [vmem:[#allocation5 + $0x250] ss:$8 sps:$4 sm:$0xff]   ;;  %v1490_v27 = vld [vmem:[#allocation5 + $0x284] ss:$8 sps:$4 sm:$0xff]  }
  0x64   :  { %767 = vmatpush1.bf16.msra.mxu0 %v1414_v15  ;;  %v1541_v15 = vld [vmem:[#allocation5 + $0xe0] ss:$8 sps:$4 sm:$0xff]   ;;  %v1544_v19 = vld [vmem:[#allocation5 + $0xf0] ss:$8 sps:$4 sm:$0xff]   ;;  %v1484_v23 = vld [vmem:[#allocation5 + $0x274] ss:$8 sps:$4 sm:$0xff]  }
  0x65   :  { %768 = vmatprep.subr.bf16.mxu0 %v1415_v16  ;;  %v1542_v16 = vld [vmem:[#allocation5 + $0xf4] ss:$8 sps:$4 sm:$0xff]   ;;  %v1482_v26 = vld [vmem:[#allocation5 + $0x270] ss:$8 sps:$4 sm:$0xff]   ;;  %v1488_v30 = vld [vmem:[#allocation5 + $0x280] ss:$8 sps:$4 sm:$0xff]  }
  0x66   :  { %724 = vmatpush1.bf16.msra.mxu1 %v1485_v38  ;;  %v1548_v20 = vld [vmem:[#allocation7 + $0x40] sm:$0xff]   ;;  %v1502_v35 = vld [vmem:[#allocation5 + $0x2a4] ss:$8 sps:$4 sm:$0xff]   ;;  %v1500_v38 = vld [vmem:[#allocation5 + $0x2a0] ss:$8 sps:$4 sm:$0xff]   ;;  %s1176_s8 = sshll.u32 %s1701_s30, 4  ;;  %s1177_s8 = int_to_ptr.vmem [resolvable:$true] %s1176_s8 }
  0x67   :  { %725 = vmatprep.subr.bf16.mxu1 %v1486_v39  ;;  %v1496_v31 = vld [vmem:[#allocation5 + $0x294] ss:$8 sps:$4 sm:$0xff]   ;;  %v1494_v34 = vld [vmem:[#allocation5 + $0x290] ss:$8 sps:$4 sm:$0xff]   ;;  %p1665_p5 = scmp.lt.s32.totalorder %s1177_s8, %s1177_s8 }
  0x68   :  { %769 = vmatpush1.bf16.msra.mxu0 %v1417_v18  ;;  %v1478_v18 = vld [vmem:[#allocation5 + $0x264] ss:$8 sps:$4 sm:$0xff]   ;;  %v1508_v39 = vld [vmem:[#allocation5 + $0x2b4] ss:$8 sps:$4 sm:$0xff]  }
  0x69   :  { %770 = vmatprep.subr.bf16.mxu0 %v1418_v21  ;;  %v1476_v21 = vld [vmem:[#allocation5 + $0x260] ss:$8 sps:$4 sm:$0xff]  }
  0x6a   :  { %726 = vmatpush1.bf16.msra.mxu1 %v1491_v42  ;;  %v1514_v42 = vld [vmem:[#allocation5 + $0x2c4] ss:$8 sps:$4 sm:$0xff]  }
  0x6b   :  { %727 = vmatprep.subr.bf16.mxu1 %v1492_v43  ;;  %v1512_v43 = vld [vmem:[#allocation5 + $0x2c0] ss:$8 sps:$4 sm:$0xff]  }
  0x6c   :  { %771 = vmatpush1.bf16.msra.mxu0 %v1420_v24  ;;  %v1549_v24 = vld [vmem:[#allocation7] sm:$0xff]  }
  0x6d   :  { %772 = vmatprep.subr.bf16.mxu0 %v1421_v25  ;;  %v1550_v25 = vld [vmem:[#allocation7 + $0x48] sm:$0xff]  }
  0x6e   :  { %728 = vmatpush1.bf16.msra.mxu1 %v1497_v46  ;;  %v1526_v46 = vld [vmem:[#allocation5 + $0x2e4] ss:$8 sps:$4 sm:$0xff]  }
  0x6f   :  { %729 = vmatprep.subr.bf16.mxu1 %v1498_v47  ;;  %v1524_v47 = vld [vmem:[#allocation5 + $0x2e0] ss:$8 sps:$4 sm:$0xff]  }
  0x70   :  { %773 = vmatpush1.bf16.msra.mxu0 %v1423_v28  ;;  %v1551_v28 = vld [vmem:[#allocation7 + $0x8] sm:$0xff]  }
  0x71   :  { %774 = vmatprep.subr.bf16.mxu0 %v1424_v29  ;;  %v1552_v29 = vld [vmem:[#allocation7 + $0x50] sm:$0xff]  }
  0x72   :  { %730 = vmatpush1.bf16.msra.mxu1 %v1503_v50  ;;  %v1540_v50 = vld [vmem:[#allocation5 + $0x304] ss:$8 sps:$4 sm:$0xff]  }
  0x73   :  { %731 = vmatprep.subr.bf16.mxu1 %v1504_v51  ;;  %v1191_v51 = vcombine.low %v1794_v56, %v1794_v56  ;;  %v1563_v56 = vld [vmem:[#allocation7 + $0x38] sm:$0xff]  }
  0x74   :  { %775 = vmatpush1.bf16.msra.mxu0 %v1426_v32  ;;  %v1553_v32 = vld [vmem:[#allocation7 + $0x10] sm:$0xff]  }
  0x75   :  { %776 = vmatprep.subr.bf16.mxu0 %v1427_v33  ;;  %v1554_v33 = vld [vmem:[#allocation7 + $0x58] sm:$0xff]  }
  0x76   :  { %732 = vmatpush1.bf16.msra.mxu1 %v1509_v54  ;;  %v1547_v54 = vld [vmem:[#allocation2 + $0x18] ss:$0 sps:$4 sm:$0xff]  }
  0x77   :  { %733 = vmatprep.subr.bf16.mxu1 %v1510_v55  ;;  %v1558_v55 = vld [vmem:[#allocation7 + $0x68] sm:$0xff]  }
  0x78   :  { %777 = vmatpush1.bf16.msra.mxu0 %v1429_v36  ;;  %v1555_v36 = vld [vmem:[#allocation7 + $0x18] sm:$0xff]  }
  0x79   :  { %778 = vmatprep.subr.bf16.mxu0 %v1430_v37  ;;  %v1556_v37 = vld [vmem:[#allocation7 + $0x60] sm:$0xff]  }
  0x7a   :  { %734 = vmatpush1.bf16.msra.mxu1 %v1515_v61  ;;  %v1699_v61 = vmov 0.0  }
  0x7b   :  { %735 = vmatprep.subr.bf16.mxu1 %v1516_v62 }
  0x7c   :  { %779 = vmatpush1.bf16.msra.mxu0 %v1432_v40  ;;  %v1557_v40 = vld [vmem:[#allocation7 + $0x20] sm:$0xff]  }
  0x7d   :  { %780 = vmatprep.subr.bf16.mxu0 %v1433_v41  ;;  %v1506_v41 = vld [vmem:[#allocation5 + $0x2b0] ss:$8 sps:$4 sm:$0xff]  }
  0x7e   :  { %736 = vmatpush1.bf16.msra.mxu1 %v1521_v3  ;;  %v186_v3 = vshrl.u32 %v185_v2, 7 }
  0x7f   :  { %737 = vmatprep.subr.bf16.mxu1 %v1522_v4 }
  0x80   :  { %781 = vmatpush1.bf16.msra.mxu0 %v1435_v44  ;;  %v1520_v44 = vld [vmem:[#allocation5 + $0x2d4] ss:$8 sps:$4 sm:$0xff]   ;;  %v187_v4 = vsub.s32 0, %v186_v3 }
  0x81   :  { %782 = vmatprep.subr.bf16.mxu0 %v1436_v45  ;;  %v1518_v45 = vld [vmem:[#allocation5 + $0x2d0] ss:$8 sps:$4 sm:$0xff]  }
  0x82   :  { %738 = vmatpush1.bf16.msra.mxu1 %v1527_v7 }
  0x83   :  { %739 = vmatprep.subr.bf16.mxu1 %v1528_v8 }
  0x84   :  { %783 = vmatpush1.bf16.msra.mxu0 %v1438_v48  ;;  %v1532_v48 = vld [vmem:[#allocation5 + $0x2f4] ss:$8 sps:$4 sm:$0xff]  }
  0x85   :  { %784 = vmatprep.subr.bf16.mxu0 %v1439_v49  ;;  %v1530_v49 = vld [vmem:[#allocation5 + $0x2f0] ss:$8 sps:$4 sm:$0xff]  }
  0x86   :  { %740 = vmatpush1.bf16.msra.mxu1 %v1533_v11 }
  0x87   :  { %741 = vmatprep.subr.bf16.mxu1 %v1536_v13 }
  0x88   :  { %785 = vmatpush1.bf16.msra.mxu0 %v1441_v52  ;;  %v1538_v52 = vld [vmem:[#allocation5 + $0x300] ss:$8 sps:$4 sm:$0xff]  }
  0x89   :  { %795 = vmatprep.subr.bf16.mxu0 %v1446_v53  ;;  %v1698_v53 = vmov 0  }
  0x8a   :  { %742 = vmatpush1.bf16.msra.mxu1 %v1541_v15 }
  0x8b   :  { %787 = vmatmul.mubr.bf16.vlgmr.msra.gmra.mrb[0].mxu0 %v1189_v57  ;;  %743 = vmatprep.subr.bf16.mxu1 %v1542_v16  ;;  %v1559_v57 = vld [vmem:[#allocation7 + $0x28] sm:$0xff]  }
  0x8c   :  { %796 = vmatpush1.bf16.msra.mxu0 %v1444_v58  ;;  %827 = vmatprep.mubr.bf16.mxu0 %v1192_v59  ;;  %v1560_v58 = vld [vmem:[#allocation7 + $0x70] sm:$0xff]  }
  0x8d   :  { %797 = vmatprep.subr.bf16.mxu0 %v1449_v60  ;;  %v1561_v59 = vld [vmem:[#allocation7 + $0x30] sm:$0xff]   ;;  %v1562_v60 = vld [vmem:[#allocation7 + $0x78] sm:$0xff]  }
  0x8e   :  { %744 = vmatpush1.bf16.msra.mxu1 %v1544_v19 }
  0x8f   :  { %1319 = vmatprep.subr.bf16.mxu1 %v1548_v20  ;;  %v1564_v20 = vld [vmem:[#allocation8] sm:$0xff]  }
  0x90   :  { %798 = vmatpush1.bf16.msra.mxu0 %v1447_v63 }
  0x91   :  { %799 = vmatprep.subr.bf16.mxu0 %v1454_v1  ;;  %746 = vmatmul.mubr.bf16.vlgmr.msra.gmra.mrb[0].mxu1 %v1187_v22  ;;  %v1565_v22 = vld [vmem:[#allocation8 + $0x8] sm:$0xff]  }
  0x92   :  { %1320 = vmatpush3.bf16.msra.mxu1 %v1549_v24  ;;  %v1567_v24 = vld [vmem:[#allocation8 + $0x18] sm:$0xff]  }
  0x93   :  { %1321 = vmatprep.subr.bf16.mxu1 %v1550_v25  ;;  %v1568_v25 = vld [vmem:[#allocation8 + $0x20] sm:$0xff]  }
  0x94   :  { %800 = vmatpush1.bf16.msra.mxu0 %v1452_v5  ;;  %v183_v5 = vld [vmem:[%s1825_s2] sm:$0x3] }
  0x95   :  { %801 = vmatprep.subr.bf16.mxu0 %v1460_v6  ;;  %v191_v6 = vsub.s32 1, %v186_v3  ;;  %v188_v7 = vrot.slane %v183_v5, %v187_v4 }
  0x96   :  { %1322 = vmatpush3.bf16.msra.mxu1 %v1551_v28  ;;  %v1571_v28 = vld [vmem:[#allocation8 + $0x38] sm:$0xff]  }
  0x97   :  { %1323 = vmatprep.subr.bf16.mxu1 %v1552_v29  ;;  %v192_v8 = vrot.slane %v183_v5, %v191_v6 }
  0x98   :  { %802 = vmatpush1.bf16.msra.mxu0 %v1458_v9 }
  0x99   :  { %803 = vmatprep.subr.bf16.mxu0 %v1466_v10 }
  0x9a   :  { %1324 = vmatpush3.bf16.msra.mxu1 %v1553_v32 }
  0x9b   :  { %1325 = vmatprep.subr.bf16.mxu1 %v1554_v33 }
  0x9c   :  { %804 = vmatpush1.bf16.msra.mxu0 %v1464_v12 }
  0x9d   :  { %805 = vmatprep.subr.bf16.mxu0 %v1472_v14 }
  0x9e   :  { %1326 = vmatpush3.bf16.msra.mxu1 %v1555_v36 }
  0x9f   :  { %1327 = vmatprep.subr.bf16.mxu1 %v1556_v37 }
  0xa0   :  { %806 = vmatpush1.bf16.msra.mxu0 %v1470_v17 }
  0xa1   :  { %807 = vmatprep.subr.bf16.mxu0 %v1478_v18 }
  0xa2   :  { %1328 = vmatpush3.bf16.msra.mxu1 %v1557_v40 }
  0xa3   :  { %1329 = vmatprep.subr.bf16.mxu1 %v1558_v55 }
  0xa4   :  { %808 = vmatpush1.bf16.msra.mxu0 %v1476_v21 }
  0xa5   :  { %809 = vmatprep.subr.bf16.mxu0 %v1484_v23  ;;  %v1566_v23 = vld [vmem:[#allocation8 + $0x10] sm:$0xff]  }
  0xa6   :  { %1330 = vmatpush3.bf16.msra.mxu1 %v1559_v57 }
  0xa7   :  { %1331 = vmatprep.subr.bf16.mxu1 %v1560_v58 }
  0xa8   :  { %810 = vmatpush1.bf16.msra.mxu0 %v1482_v26  ;;  %v1569_v26 = vld [vmem:[#allocation8 + $0x28] sm:$0xff]  }
  0xa9   :  { %811 = vmatprep.subr.bf16.mxu0 %v1490_v27  ;;  %v1570_v27 = vld [vmem:[#allocation8 + $0x30] sm:$0xff]  }
  0xaa   :  { %1332 = vmatpush3.bf16.msra.mxu1 %v1561_v59 }
  0xab   :  { %1333 = vmatprep.subr.bf16.mxu1 %v1562_v60 }
  0xac   :  { %812 = vmatpush1.bf16.msra.mxu0 %v1488_v30  ;;  %v1293_v30 = vld [vmem:[%s1827_s4] ss:$0 sm:$0xff]  ;;  %s1660_s4 = scalar_lea.vmem %s1177_s8, 128 }
  0xad   :  { %813 = vmatprep.subr.bf16.mxu0 %v1496_v31  ;;  %p1661_p4 = scmp.ne.s32.totalorder %s1177_s8, %s1660_s4  ;;  %p1666_p6 = scmp.lt.s32.totalorder %s1660_s4, %s1660_s4 }
  0xae   :  { %1334 = vmatpush3.bf16.msra.mxu1 %v1563_v56 }
  0xaf   :  { %1350 = vmatprep.subr.bf16.mxu1 %v1699_v61  ;;  %p1667_p7 = por %p1666_p6, %p1665_p5 }
  0xb0   :  { %814 = vmatpush1.bf16.msra.mxu0 %v1494_v34 }
  0xb1   :  { %815 = vmatprep.subr.bf16.mxu0 %v1502_v35  ;;  %p1668_p8 = pnand %p1667_p7, %p1661_p4 }
  0xb4   :  { %816 = vmatpush1.bf16.msra.mxu0 %v1500_v38  ;;  %v1310_v38 = vld [vmem:[%s1829_s6] ss:$0 sm:$0xff] }
  0xb5   :  { %817 = vmatprep.subr.bf16.mxu0 %v1508_v39 }
  0xb8   :  { %818 = vmatpush1.bf16.msra.mxu0 %v1506_v41 }
  0xb9   :  { %819 = vmatprep.subr.bf16.mxu0 %v1514_v42 }
  0xbc   :  { %820 = vmatpush1.bf16.msra.mxu0 %v1512_v43 }
  0xbd   :  { %821 = vmatprep.subr.bf16.mxu0 %v1520_v44 }
  0xc0   :  { %822 = vmatpush1.bf16.msra.mxu0 %v1518_v45 }
  0xc1   :  { %823 = vmatprep.subr.bf16.mxu0 %v1526_v46 }
  0xc4   :  { %824 = vmatpush1.bf16.msra.mxu0 %v1524_v47 }
  0xc5   :  { %825 = vmatprep.subr.bf16.mxu0 %v1532_v48 }
  0xc8   :  { %826 = vmatpush1.bf16.msra.mxu0 %v1530_v49 }
  0xc9   :  { %836 = vmatprep.subr.bf16.mxu0 %v1540_v50 }
  0xcb   :  { %828 = vmatmul.mubr.bf16.vlgmr.msra.gmra.mrb[0].mxu0 %v1191_v51 }
  0xcc   :  { %837 = vmatpush1.bf16.msra.mxu0 %v1538_v52  ;;  %868 = vmatprep.mubr.bf16.mxu0 %v1698_v53 }
  0xd7   :  { %1292 = vmatmul.mubr.msk.bf16.vlgmr.msra.gmra.mrb[0].mxu0 %vm709_vm0, %v1547_v54 }
 0x164   :  { %v747_v62 = vpop.f32.mrb[0].mxu1 }
 0x165   :  { %v749_v63 = vpop.f32.mrb[1].mxu1  ;;  %v748_v9 = vadd.f32 %v747_v62, %v188_v7 }
 0x166   :  { %v751_v0 = vpop.f32.mrb[2].mxu1  ;;  %v750_v10 = vadd.f32 %v749_v63, %v192_v8 }
 0x167   :  { %v752_v1 = vpop.f32.mrb[3].mxu1 }
 0x1aa   :  { %v870_v11 = vpop.f32.mrb[0].mxu0 }
 0x1ab   :  { %v1371_v12 = vadd.f32 %v870_v11, %v748_v9  ;;  %v872_v13 = vpop.f32.mrb[1].mxu0 }
 0x1ac   :  { %v1373_v14 = vadd.f32 %v872_v13, %v750_v10  ;;  %v874_v15 = vpop.f32.mrb[2].mxu0 }
 0x1ad   :  { %v877_v16 = vmax.f32 %v1371_v12, 0.0  ;;  %v875_v17 = vpop.f32.mrb[3].mxu0 }
 0x1ae   :  { %v878_v18 = vmax.f32 %v1373_v14, 0.0 }
 0x1af   :  { %v879_v21 = vpack.c.bf16 %v877_v16, %v877_v16 }
 0x1b0   :  { %v880_v19 = vpack.c.bf16 %v878_v18, %v878_v18 }
 0x1b2   :  { %1048 = vmatprep.mubr.bf16.mxu1 %v880_v19 }
 0x1b3   :  { %1049 = vmatmul.mubr.bf16.vlgmr.msra.gmra.mrb[4].mxu1 %v879_v21 }
 0x1b4   :  { %1351 = vmatpush3.bf16.msra.mxu1 %v1564_v20  ;;  %1366 = vmatprep.mubr.msk.bf16.mxu1 %vm1700_vm1, %v1699_v61 }
 0x1b5   :  { %1352 = vmatprep.subr.bf16.mxu1 %v1699_v61 }
 0x1b8   :  { %1353 = vmatpush3.bf16.msra.mxu1 %v1565_v22 }
 0x1b9   :  { %1354 = vmatprep.subr.bf16.mxu1 %v1699_v61 }
 0x1bc   :  { %1355 = vmatpush3.bf16.msra.mxu1 %v1566_v23 }
 0x1bd   :  { %1356 = vmatprep.subr.bf16.mxu1 %v1699_v61 }
 0x1c0   :  { %1357 = vmatpush3.bf16.msra.mxu1 %v1567_v24 }
 0x1c1   :  { %1358 = vmatprep.subr.bf16.mxu1 %v1699_v61 }
 0x1c4   :  { %1359 = vmatpush3.bf16.msra.mxu1 %v1568_v25 }
 0x1c5   :  { %1360 = vmatprep.subr.bf16.mxu1 %v1699_v61 }
 0x1c8   :  { %1361 = vmatpush3.bf16.msra.mxu1 %v1569_v26 }
 0x1c9   :  { %1362 = vmatprep.subr.bf16.mxu1 %v1699_v61 }
 0x1cc   :  { %1363 = vmatpush3.bf16.msra.mxu1 %v1570_v27 }
 0x1cd   :  { %1364 = vmatprep.subr.bf16.mxu1 %v1699_v61 }
 0x1d0   :  { %1365 = vmatpush3.bf16.msra.mxu1 %v1571_v28 }
 0x286   :  { %v1335_v29 = vpop.f32.mrb[4].mxu1 }
 0x287   :  { %v1336_v31 = vpop.f32.mrb[5].mxu1 }
 0x288   :  { %v1337_v32 = vadd.f32 %v1336_v31, %v1335_v29  ;;  %v1338_v33 = vpop.f32.mrb[6].mxu1 }
 0x289   :  { %v1339_v34 = vpop.f32.mrb[7].mxu1 }
 0x28a   :  { %v1051_v35 = vadd.f32 %v1337_v32, %v1293_v30 }
 0x28c   :  { %v1056_v36 = vmax.f32 %v1051_v35, 0.0 }
 0x28e   :  { %v1057_v37 = vpack.c.bf16 %v1056_v36, %v1056_v36 }
 0x290   :  { %1367 = vmatmul.mubr.bf16.vlgmr.msra.gmra.mrb[8].mxu1 %v1057_v37 }
 0x363   :  { %v1163_v39 = vpop.f32.mrb[8].mxu1 }
 0x364   :  { %v1164_v40 = vadd.f32 %v1310_v38, %v1163_v39  ;;  %v1368_v41 = vpop.f32.mrb[9].mxu1 }
 0x365   :  { %v1166_v42 = vpop.f32.mrb[10].mxu1 }
 0x366   :  { %1169 = vst [vmem:[#allocation10] sm:$0xff] %v1164_v40  ;;  %v1369_v43 = vpop.f32.mrb[11].mxu1 }
 0x367   :  { %1671 = shalt.err (!%p1668_p8)
}
 0x368   :  { %s1672_s6 = scalar_lea.hbm %s1830_s7, 128 }
 0x369   :  { %p1673_p9 = scmp.ne.s32.totalorder %s1830_s7, %s1672_s6  ;;  %p1676_p10 = scmp.lt.u32.totalorder %s1672_s6, %s1830_s7 }
 0x36b   :  { %p1678_p11 = pnand %p1676_p10, %p1673_p9 }
 0x36d   :  { %1681 = shalt.err (!%p1678_p11)
}
 0x36e   :  { %1179 = dma.vmem_to_hbm [thread:$0]  %s1177_s8, 128, %s1830_s7, [#allocation4]  }
 0x36f   :  { %1688 = dma.done.wait [#allocation4], 128  }
 0x370   :  { %1689 = vsyncadd [#allocation4], 4294967168 }
 0x371   :  { %1183 = vsyncpa [#allocation3], 1 }
 0x372   :  { %1184 = vsyncpa [#allocation6], 1 }
 0x373   :  { %1185 = vsyncpa [#allocation9], 1 }
 0x374   :  { %1186 = vsyncpa [#allocation4], 1 }

</bundles_post_ra>
